<compile_context>
chip_gen: v5e
topology: v5e:2x2
jax: 0.10.0
libtpu: 0.0.40
codegen_flags: <defaults>
</compile_context>

<pallas_src>
import math

import jax
import jax.numpy as jnp
from jax.experimental import pallas as pl
from jax.experimental.pallas import tpu as pltpu

LANE = 128


def _round_up(n, m):
    return ((n + m - 1) // m) * m


def classifier_kernel(x_ref, w_ref, p_ref, out_f_ref, out_r_ref, tcam_ref):
    # x_ref:    (tm, F)      row tile of flattened inputs
    # w_ref:    (F, 2*Cp)    block-diagonal [W_f | W_r], lane-padded per half
    # p_ref:    (8, 2*Cp)    row 0 = [b_f | b_r], row 1 = [mul_f | mul_r]
    # out_*_ref:(tm, C)      true-width outputs (no zero-padding written back)
    cp = w_ref.shape[1] // 2
    c = out_f_ref.shape[1]

    # Single MXU pass over the fused weight (replaces two K=F/2 matmuls and
    # any sub-vreg lane slicing of x).
    y = jnp.dot(x_ref[...], w_ref[...], preferred_element_type=jnp.float32)
    y = y + p_ref[0:1, :]                      # fused bias [b_f | b_r]

    cls_f = y[:, :c]                           # lanes [0, C)
    cls_r = y[:, cp:cp + c]                    # lanes [Cp, Cp+C) — vreg-aligned start
    mul_f = p_ref[1:2, :c]
    mul_r = p_ref[1:2, cp:cp + c]

    out_f_ref[...] = cls_f.astype(out_f_ref.dtype)
    out_r_ref[...] = cls_r.astype(out_r_ref.dtype)
    tcam_ref[...] = (cls_r * mul_r + cls_f * mul_f).astype(tcam_ref.dtype)


def pack_classifier_params(w_f, b_f, w_r, b_r, mul_f, mul_r):
    """Build the fused block-diagonal weight and packed bias/mul buffer ONCE
    (hoisted out of the per-call path).  w_f/w_r: (F/2, C) stored (in, out)."""
    half, C = w_f.shape
    assert w_r.shape == (half, C)
    F = 2 * half
    Cp = _round_up(C, LANE)

    w_cat = jnp.zeros((F, 2 * Cp), jnp.float32)
    w_cat = w_cat.at[:half, :C].set(w_f.astype(jnp.float32))
    w_cat = w_cat.at[half:, Cp:Cp + C].set(w_r.astype(jnp.float32))

    params = jnp.zeros((8, 2 * Cp), jnp.float32)
    params = params.at[0, :C].set(b_f.astype(jnp.float32))
    params = params.at[0, Cp:Cp + C].set(b_r.astype(jnp.float32))
    params = params.at[1, :C].set(mul_f.astype(jnp.float32))
    params = params.at[1, Cp:Cp + C].set(mul_r.astype(jnp.float32))
    return w_cat, params


def classifier_forward(x, w_cat, params, *, num_class, tm=2048):
    """x: (B, T, F) float32.  w_cat/params: from pack_classifier_params.
    Returns (cls_x_f, cls_x_r, tcam), each (B, T, num_class) — matches the
    PyTorch Classifier.forward."""
    B, T, F = x.shape
    assert F % 2 == 0, "n_feature must be even (matches the PyTorch module)"
    assert w_cat.shape[0] == F
    C = num_class
    Cp = w_cat.shape[1] // 2
    M = B * T

    # Tile derived from the step count (padding waste bounded by ~8*grid rows)
    # and step count kept even when >1 so v7x's two TCs get balanced work.
    steps = pl.cdiv(M, tm)
    if steps > 1 and steps % 2 == 1:
        steps += 1
    tm_eff = max(8, _round_up(pl.cdiv(M, steps), 8))
    grid = (pl.cdiv(M, tm_eff),)

    x2 = x.reshape(M, F).astype(jnp.float32)     # free row-major view, no pad
    out_sd = jax.ShapeDtypeStruct((M, C), jnp.float32)

    cls_f, cls_r, tcam = pl.pallas_call(
        classifier_kernel,
        out_shape=(out_sd, out_sd, out_sd),
        grid_spec=pltpu.PrefetchScalarGridSpec(
            num_scalar_prefetch=0,
            grid=grid,
            in_specs=[
                pl.BlockSpec((tm_eff, F), lambda i: (i, 0)),
                pl.BlockSpec((F, 2 * Cp), lambda i: (0, 0)),
                pl.BlockSpec((8, 2 * Cp), lambda i: (0, 0)),
            ],
            out_specs=[
                pl.BlockSpec((tm_eff, C), lambda i: (i, 0)),
                pl.BlockSpec((tm_eff, C), lambda i: (i, 0)),
                pl.BlockSpec((tm_eff, C), lambda i: (i, 0)),
            ],
        ),
        compiler_params=pltpu.CompilerParams(
            dimension_semantics=("parallel",)),
    )(x2, w_cat, params)

    # Reshape only — no slicing, no second HBM pass over the outputs.
    return (cls_f.reshape(B, T, C),
            cls_r.reshape(B, T, C),
            tcam.reshape(B, T, C))


def xavier_uniform(key, out_features, in_features):
    # matches torch.nn.init.xavier_uniform_ on a (out, in) Linear weight
    bound = math.sqrt(6.0 / (in_features + out_features))
    return jax.random.uniform(key, (out_features, in_features),
                              minval=-bound, maxval=bound, dtype=jnp.float32)


if __name__ == "__main__":
    # small shapes consistent with the module: batch=2, seq=8, n_feature=32
    B, T = 2, 8
    n_feature = 32
    num_class = 81
    half = n_feature // 2

    key = jax.random.PRNGKey(0)
    k_x, k_wf, k_wr = jax.random.split(key, 3)

    x = jax.random.normal(k_x, (B, T, n_feature), dtype=jnp.float32)

    # deterministic params (xavier uniform weights, zero biases, ones muls)
    w_f_torch = xavier_uniform(k_wf, num_class, half)   # (out, in) as in PyTorch
    w_r_torch = xavier_uniform(k_wr, num_class, half)
    w_f = w_f_torch.T                                    # (in, out) for the kernel
    w_r = w_r_torch.T
    b_f = jnp.zeros((num_class,), jnp.float32)
    b_r = jnp.zeros((num_class,), jnp.float32)
    mul_f = jnp.ones((num_class,), jnp.float32)
    mul_r = jnp.ones((num_class,), jnp.float32)

    # Fused-parameter assembly runs once, next to the weights.
    w_cat, params = pack_classifier_params(w_f, b_f, w_r, b_r, mul_f, mul_r)

    fwd = jax.jit(classifier_forward, static_argnames=("num_class", "tm"))
    cls_f, cls_r, tcam = fwd(x, w_cat, params, num_class=num_class)
    jax.block_until_ready((cls_f, cls_r, tcam))

    # reference check in plain JAX
    ref_f = x[:, :, :half] @ w_f + b_f
    ref_r = x[:, :, half:] @ w_r + b_r
    ref_t = ref_r * mul_r + ref_f * mul_f
    assert cls_f.shape == (B, T, num_class)
    assert cls_r.shape == (B, T, num_class)
    assert tcam.shape == (B, T, num_class)
    assert jnp.allclose(cls_f, ref_f, atol=1e-5)
    assert jnp.allclose(cls_r, ref_r, atol=1e-5)
    assert jnp.allclose(tcam, ref_t, atol=1e-5)

    print("KERNEL_OK")
</pallas_src>

<mosaic_0001>
module attributes {stable_mosaic.version = 11 : i64} {
  func.func @classifier_kernel(%arg0: i32, %arg1: memref<16x32xf32, #tpu.memory_space<vmem>>, %arg2: memref<32x256xf32, #tpu.memory_space<vmem>>, %arg3: memref<8x256xf32, #tpu.memory_space<vmem>>, %arg4: memref<16x81xf32, #tpu.memory_space<vmem>>, %arg5: memref<16x81xf32, #tpu.memory_space<vmem>>, %arg6: memref<16x81xf32, #tpu.memory_space<vmem>>) attributes {dimension_semantics = [#tpu.dimension_semantics<parallel>], iteration_bounds = array<i64: 1>, scalar_prefetch = 0 : i64, scratch_operands = 0 : i64, tpu.core_type = #tpu.core_type<tc>, window_params = [{transform_indices = @transform_0, window_bounds = array<i64: 16, 32>}, {pipeline_mode = #tpu.pipeline_mode<synchronous>, transform_indices = @transform_1, window_bounds = array<i64: 32, 256>}, {pipeline_mode = #tpu.pipeline_mode<synchronous>, transform_indices = @transform_2, window_bounds = array<i64: 8, 256>}, {transform_indices = @transform_3, window_bounds = array<i64: 16, 81>}, {transform_indices = @transform_4, window_bounds = array<i64: 16, 81>}, {transform_indices = @transform_5, window_bounds = array<i64: 16, 81>}]} {
    %c0 = arith.constant 0 : index
    %c0_0 = arith.constant 0 : index
    %0 = vector.load %arg1[%c0, %c0_0] : memref<16x32xf32, #tpu.memory_space<vmem>>, vector<16x32xf32>
    %c0_1 = arith.constant 0 : index
    %c0_2 = arith.constant 0 : index
    %1 = vector.load %arg2[%c0_1, %c0_2] : memref<32x256xf32, #tpu.memory_space<vmem>>, vector<32x256xf32>
    %cst = arith.constant dense<0.000000e+00> : vector<16x256xf32>
    %2 = tpu.matmul %0, %1, %cst {dimension_numbers = #tpu.dot_dimension_numbers<[1], [0], [0], [1], [0, 0, 1, 1], [], []>} : vector<16x32xf32>, vector<32x256xf32>, vector<16x256xf32> -> vector<16x256xf32>
    %c0_3 = arith.constant 0 : index
    %c0_4 = arith.constant 0 : index
    %3 = vector.load %arg3[%c0_3, %c0_4] : memref<8x256xf32, #tpu.memory_space<vmem>>, vector<1x256xf32>
    %4 = vector.broadcast %3 : vector<1x256xf32> to vector<16x256xf32>
    %5 = arith.addf %2, %4 : vector<16x256xf32>
    %6 = vector.extract_strided_slice %5 {offsets = [0, 0], sizes = [16, 81], strides = [1, 1]} : vector<16x256xf32> to vector<16x81xf32>
    %7 = vector.extract_strided_slice %5 {offsets = [0, 128], sizes = [16, 81], strides = [1, 1]} : vector<16x256xf32> to vector<16x81xf32>
    %c1 = arith.constant 1 : index
    %c0_5 = arith.constant 0 : index
    %8 = vector.load %arg3[%c1, %c0_5] : memref<8x256xf32, #tpu.memory_space<vmem>>, vector<1x81xf32>
    %c1_6 = arith.constant 1 : index
    %c128 = arith.constant 128 : index
    %9 = vector.load %arg3[%c1_6, %c128] : memref<8x256xf32, #tpu.memory_space<vmem>>, vector<1x81xf32>
    %c0_7 = arith.constant 0 : index
    %c0_8 = arith.constant 0 : index
    %10 = vector.load %arg4[%c0_7, %c0_8] : memref<16x81xf32, #tpu.memory_space<vmem>>, vector<16x81xf32>
    tpu.vector_store %arg4[%c0_7, %c0_8], %6 {strides = array<i32>} : memref<16x81xf32, #tpu.memory_space<vmem>>, vector<16x81xf32>,
    %c0_9 = arith.constant 0 : index
    %c0_10 = arith.constant 0 : index
    %11 = vector.load %arg5[%c0_9, %c0_10] : memref<16x81xf32, #tpu.memory_space<vmem>>, vector<16x81xf32>
    tpu.vector_store %arg5[%c0_9, %c0_10], %7 {strides = array<i32>} : memref<16x81xf32, #tpu.memory_space<vmem>>, vector<16x81xf32>,
    %12 = vector.broadcast %9 : vector<1x81xf32> to vector<16x81xf32>
    %13 = arith.mulf %7, %12 : vector<16x81xf32>
    %14 = vector.broadcast %8 : vector<1x81xf32> to vector<16x81xf32>
    %15 = arith.mulf %6, %14 : vector<16x81xf32>
    %16 = arith.addf %13, %15 : vector<16x81xf32>
    %c0_11 = arith.constant 0 : index
    %c0_12 = arith.constant 0 : index
    %17 = vector.load %arg6[%c0_11, %c0_12] : memref<16x81xf32, #tpu.memory_space<vmem>>, vector<16x81xf32>
    tpu.vector_store %arg6[%c0_11, %c0_12], %16 {strides = array<i32>} : memref<16x81xf32, #tpu.memory_space<vmem>>, vector<16x81xf32>,
    return
  }
  func.func @transform_0(%arg0: i32) -> (i32, i32) {
    %c0_i32 = arith.constant 0 : i32
    %c0_i32_0 = arith.constant 0 : i32
    return %arg0, %c0_i32 : i32, i32
  }
  func.func @transform_1(%arg0: i32) -> (i32, i32) {
    %c0_i32 = arith.constant 0 : i32
    %c0_i32_0 = arith.constant 0 : i32
    %c0_i32_1 = arith.constant 0 : i32
    return %c0_i32, %c0_i32_0 : i32, i32
  }
  func.func @transform_2(%arg0: i32) -> (i32, i32) {
    %c0_i32 = arith.constant 0 : i32
    %c0_i32_0 = arith.constant 0 : i32
    %c0_i32_1 = arith.constant 0 : i32
    return %c0_i32, %c0_i32_0 : i32, i32
  }
  func.func @transform_3(%arg0: i32) -> (i32, i32) {
    %c0_i32 = arith.constant 0 : i32
    %c0_i32_0 = arith.constant 0 : i32
    return %arg0, %c0_i32 : i32, i32
  }
  func.func @transform_4(%arg0: i32) -> (i32, i32) {
    %c0_i32 = arith.constant 0 : i32
    %c0_i32_0 = arith.constant 0 : i32
    return %arg0, %c0_i32 : i32, i32
  }
  func.func @transform_5(%arg0: i32) -> (i32, i32) {
    %c0_i32 = arith.constant 0 : i32
    %c0_i32_0 = arith.constant 0 : i32
    return %arg0, %c0_i32 : i32, i32
  }
}

</mosaic_0001>

<bundles_post_ra>
// kernel: classifier_forward.1
= control target key start
LH: loop header
LB: loop body
LE: loop exit
PB: predicated region body
PF: predicated region fallthrough
CT: control target
= control target key end

     0   :  { %11 = vsyncpa [#allocation3], 0  ;;  %s456_s0 = inlined_call_operand.hbm [shape: f32[16,32], index: 0, kind: input, shape index: {}]   ;;  %s457_s1 = inlined_call_operand.hbm [shape: f32[32,256], index: 1, kind: input, shape index: {}]   ;;  %s458_s2 = inlined_call_operand.hbm [shape: f32[8,256], index: 2, kind: input, shape index: {}]   ;;  %s459_s3 = inlined_call_operand.hbm [shape: f32[16,81], index: 3, kind: output, shape index: {0}]   ;;  %s460_s4 = inlined_call_operand.hbm [shape: f32[16,81], index: 4, kind: output, shape index: {1}]   ;;  %s461_s5 = inlined_call_operand.hbm [shape: f32[16,81], index: 5, kind: output, shape index: {2}]  }
   0x1   :  { %12 = vsyncpa [#allocation6], 0 }
   0x2   :  { %13 = vsyncpa [#allocation4], 0  ;;  %s32_s20 = sshll.u32 %s457_s1, 4  ;;  %s33_s20 = int_to_ptr.hbm [resolvable:$true] %s32_s20 }
   0x3   :  { %14 = vsyncpa [#allocation10], 0  ;;  %s377_s21 = smov [#allocation5]   ;;  %s19_s25 = sshll.u32 %s456_s0, 4  ;;  %s20_s25 = int_to_ptr.hbm [resolvable:$true] %s19_s25 }
   0x4   :  { %s34_s22 = sshll.u32 %s377_s21, 4  ;;  %s378_s26 = smov 256   ;;  %s35_s22 = int_to_ptr.vmem [resolvable:$true] %s34_s22 }
   0x5   :  { %s379_s27 = smov 16   ;;  %s380_s28 = smov [#allocation2]  }
   0x6   :  { %40 = dma.hbm_to_vmem [thread:$0]  %s33_s20, 1024, %s35_s22, [#allocation6], %s378_s26, %s378_s26, %s379_s27  }
   0x7   :  { %s21_s29 = sshll.u32 %s380_s28, 4  ;;  %s381_s30 = smov 128   ;;  %s22_s29 = int_to_ptr.vmem [resolvable:$true] %s21_s29 }
   0x8   :  { %s382_s6 = smov 8   ;;  %s46_s8 = sshll.u32 %s458_s2, 4  ;;  %s47_s8 = int_to_ptr.hbm [resolvable:$true] %s46_s8 }
   0x9   :  { %27 = dma.hbm_to_vmem [thread:$0]  %s20_s25, 256, %s22_s29, [#allocation3], %s381_s30, %s381_s30, %s382_s6  }
   0xa   :  { %s383_s9 = smov [#allocation7]  }
   0xb   :  { %s48_s0 = sshll.u32 %s383_s9, 4  ;;  %s49_s0 = int_to_ptr.vmem [resolvable:$true] %s48_s0 }
   0xc   :  { %51 = dma.hbm_to_vmem [thread:$0]  %s47_s8, 256, %s49_s0, [#allocation6]  }
   0xd   :  { %369 = dma.done.wait [#allocation3], 256  }
   0xe   :  { %370 = vsyncadd [#allocation3], 4294967040 }
   0xf   :  { %371 = dma.done.wait [#allocation6], 1280  }
  0x10   :  { %372 = vsyncadd [#allocation6], 4294966016  ;;  %v72_v0 = vld [vmem:[#allocation5 + $0x30] sm:$0xff]  ;;  %v73_v1 = vld [vmem:[#allocation5 + $0x38] sm:$0xff]  ;;  %vm80_vm0 = vcmask 261120   ;;  %vm135_vm1 = vcmask 662528  }
  0x11   :  { %v70_v2 = vld [vmem:[#allocation5 + $0x20] sm:$0xff]  ;;  %207 = vmatpush.msra.mxu2 %v72_v0  ;;  %211 = vmatpush.msra.mxu3 %v73_v1  ;;  %v71_v3 = vld [vmem:[#allocation5 + $0x28] sm:$0xff]  ;;  %v68_v4 = vld [vmem:[#allocation5 + $0x10] sm:$0xff]  ;;  %s384_s2 = smov [#allocation8]   ;;  %s154_s13 = sshll.u32 %s459_s3, 4  ;;  %s155_s13 = int_to_ptr.hbm [resolvable:$true] %s154_s13 }
  0x12   :  { %v69_v5 = vld [vmem:[#allocation5 + $0x18] sm:$0xff]  ;;  %99 = vmatpush.msra.mxu0 %v72_v0  ;;  %122 = vmatpush.msra.mxu1 %v73_v1  ;;  %v66_v6 = vld [vmem:[#allocation5] sm:$0xff]  ;;  %v67_v7 = vld [vmem:[#allocation5 + $0x8] sm:$0xff]  ;;  %s429_s10 = sshll.u32 %s384_s2, 4  ;;  %s385_s14 = smov [#allocation9]   ;;  %s153_s10 = int_to_ptr.vmem [resolvable:$true] %s429_s10 }
  0x13   :  { %208 = vmatpush.msra.mxu2 %v70_v2  ;;  %212 = vmatpush.msra.mxu3 %v71_v3  ;;  %v65_v8 = vld [vmem:[#allocation2 + $0x8] sm:$0xff]  ;;  %v64_v9 = vld [vmem:[#allocation2] sm:$0xff]  ;;  %v74_v10 = vld [vmem:[#allocation7] ss:$8 sm:$0x3]  ;;  %s165_s15 = sshll.u32 %s385_s14, 4  ;;  %s166_s15 = int_to_ptr.vmem [resolvable:$true] %s165_s15 }
  0x14   :  { %100 = vmatpush.msra.mxu0 %v70_v2  ;;  %123 = vmatpush.msra.mxu1 %v71_v3  ;;  %v76_v11 = vperm.slane %v74_v10, 0  ;;  %v77_v12 = vperm.slane %v74_v10, 1  ;;  %v133_v14 = vld [vmem:[#allocation7 + $0x1] ss:$0 sm:$0xff]  ;;  %v134_v16 = vld [vmem:[#allocation7 + $0x9] ss:$0 sm:$0xff] }
  0x15   :  { %209 = vmatpush.msra.mxu2 %v68_v4  ;;  %213 = vmatpush.msra.mxu3 %v69_v5  ;;  %s167_s18 = sshll.u32 %s460_s4, 4  ;;  %s386_s3 = smov [#allocation11]   ;;  %s168_s18 = int_to_ptr.hbm [resolvable:$true] %s167_s18 }
  0x16   :  { %101 = vmatpush.msra.mxu0 %v68_v4  ;;  %124 = vmatpush.msra.mxu1 %v69_v5  ;;  %s178_s19 = sshll.u32 %s386_s3, 4  ;;  %s180_s22 = sshll.u32 %s461_s5, 4  ;;  %s179_s19 = int_to_ptr.vmem [resolvable:$true] %s178_s19  ;;  %s181_s22 = int_to_ptr.hbm [resolvable:$true] %s180_s22 }
  0x17   :  { %210 = vmatpush.msra.mxu2 %v66_v6  ;;  %214 = vmatpush.msra.mxu3 %v67_v7 }
  0x18   :  { %204 = vmatmul.msk.f32.vlgmr.msra.gmra.mxu2 %vm80_vm0, %v65_v8  ;;  %206 = vmatmul.msk.f32.vlgmr.msra.gmra.mxu3 %vm80_vm0, %v65_v8 }
  0x19   :  { %102 = vmatpush.msra.mxu0 %v66_v6  ;;  %125 = vmatpush.msra.mxu1 %v67_v7 }
  0x1a   :  { %203 = vmatmul.msk.f32.vlgmr.msra.gmra.mxu0 %vm80_vm0, %v64_v9  ;;  %205 = vmatmul.msk.f32.vlgmr.msra.gmra.mxu1 %vm80_vm0, %v64_v9 }
  0x97   :  { %v104_v13 = vpop.f32.mrf.mxu0  ;;  %v127_v15 = vpop.f32.mrf.mxu1 }
  0x98   :  { %v105_v17 = vadd.f32 %v104_v13, %v76_v11  ;;  %v128_v18 = vadd.f32 %v127_v15, %v77_v12 }
  0x9a   :  { %136 = vst.msk [vmem:[#allocation8] sm:$0xff] %vm135_vm1, %v105_v17  ;;  %v142_v19 = vmul.f32 %v133_v14, %v105_v17  ;;  %v140_v20 = vmul.f32 %v134_v16, %v128_v18 }
  0x9b   :  { %v107_v21 = vpop.f32.mrf.mxu2  ;;  %138 = vst.msk [vmem:[#allocation9] sm:$0xff] %vm135_vm1, %v128_v18  ;;  %v130_v22 = vpop.f32.mrf.mxu3 }
  0x9c   :  { %v108_v23 = vadd.f32 %v107_v21, %v76_v11  ;;  %v144_v24 = vadd.f32 %v142_v19, %v140_v20  ;;  %v131_v25 = vadd.f32 %v130_v22, %v77_v12 }
  0x9e   :  { %137 = vst.msk [vmem:[#allocation8 + $0x8] sm:$0xff] %vm135_vm1, %v108_v23  ;;  %v143_v26 = vmul.f32 %v133_v14, %v108_v23  ;;  %v141_v27 = vmul.f32 %v134_v16, %v131_v25 }
  0x9f   :  { %146 = vst.msk [vmem:[#allocation11] sm:$0xff] %vm135_vm1, %v144_v24  ;;  %160 = dma.vmem_to_hbm [thread:$0]  %s153_s10, 256, %s155_s13, [#allocation4], %s381_s30, %s381_s30, %s382_s6  }
  0xa0   :  { %139 = vst.msk [vmem:[#allocation9 + $0x8] sm:$0xff] %vm135_vm1, %v131_v25  ;;  %v145_v28 = vadd.f32 %v143_v26, %v141_v27 }
  0xa1   :  { %173 = dma.vmem_to_hbm [thread:$0]  %s166_s15, 256, %s168_s18, [#allocation10], %s381_s30, %s381_s30, %s382_s6  }
  0xa2   :  { %147 = vst.msk [vmem:[#allocation11 + $0x8] sm:$0xff] %vm135_vm1, %v145_v28 }
  0xa3   :  { %186 = dma.vmem_to_hbm [thread:$0]  %s179_s19, 256, %s181_s22, [#allocation10], %s381_s30, %s381_s30, %s382_s6  }
  0xa4   :  { %373 = dma.done.wait [#allocation4], 256  }
  0xa5   :  { %374 = vsyncadd [#allocation4], 4294967040 }
  0xa6   :  { %375 = dma.done.wait [#allocation10], 512  }
  0xa7   :  { %376 = vsyncadd [#allocation10], 4294966784 }
  0xa8   :  { %199 = vsyncpa [#allocation3], 1 }
  0xa9   :  { %200 = vsyncpa [#allocation6], 1 }
  0xaa   :  { %201 = vsyncpa [#allocation4], 1 }
  0xab   :  { %202 = vsyncpa [#allocation10], 1 }

</bundles_post_ra>
